<compile_context>
chip_gen: v7x
topology: tpu7x:2x2x1
jax: 0.10.0
libtpu: 0.0.40
codegen_flags: <defaults>
</compile_context>

<pallas_src>
import jax
import jax.numpy as jnp
from jax.experimental import pallas as pl
from jax.experimental.pallas import tpu as pltpu


# ---------------------------------------------------------------------------
# Kernels
# ---------------------------------------------------------------------------
def _rf_kernel(x_ref, wt_ref, b_ref, o_ref):
    # x_ref: (C, S_tile)  spatial on lanes; wt_ref: (Cout, C); b_ref: (Cout, 1)
    x = x_ref[...].astype(jnp.float32)                      # upcast (bf16 I/O case)
    y = jnp.dot(wt_ref[...], x, preferred_element_type=jnp.float32)
    o_ref[...] = jnp.maximum(y + b_ref[...], 0.0).astype(o_ref.dtype)


def _rf_kernel_with_dummy(x_ref, d_ref, wt_ref, b_ref, o_ref):
    xd = x_ref[...].astype(jnp.float32) * d_ref[...].astype(jnp.float32)
    y = jnp.dot(wt_ref[...], xd, preferred_element_type=jnp.float32)
    o_ref[...] = jnp.maximum(y + b_ref[...], 0.0).astype(o_ref.dtype)


# ---------------------------------------------------------------------------
# Tiling: lane tile from a VMEM working-set byte budget (not a divisor rule)
# ---------------------------------------------------------------------------
def _pick_s_tile(S, B, bytes_per_lane, budget_bytes):
    if S < 128:
        return S                                            # full-extent block (legal)
    budget_lanes = max(128, budget_bytes // max(bytes_per_lane, 1))
    s_tile = max(128, (min(budget_lanes, S) // 128) * 128)  # multiple of 128, <= S
    # v7x megacore: with B == 1 keep >= 2 spatial tiles when S allows a split.
    if B == 1 and S >= 256:
        s_half = max(128, ((S // 2) // 128) * 128)
        s_tile = min(s_tile, s_half)
    return s_tile


# ---------------------------------------------------------------------------
# Wrapper
# ---------------------------------------------------------------------------
def rf_model_forward(x_nchw, w, b, dummy_nchw=None, *, io_dtype=None,
                     vmem_budget_bytes=8 * 1024 * 1024):
    """RFModel tensor branch: relu(conv1x1_{w,b}(dummy * x)).

    x_nchw:     [B, C, H, W]
    w:          [C, Cout]   (PyTorch Conv2d weight (Cout, C, 1, 1) -> squeeze + transpose)
    b:          [Cout] or [1, Cout]
    dummy_nchw: None  -> dummy is statically all-ones (RFModel init state);
                         the read and multiply are elided at trace time.
                tensor -> trained dummy, multiplied in-kernel.
    io_dtype:   dtype for x/dummy/output HBM traffic (e.g. jnp.bfloat16);
                compute is f32 inside the kernel.
    """
    B, C, H, W = x_nchw.shape
    Cout = w.shape[1]
    S = H * W
    io_dtype = jnp.dtype(io_dtype or x_nchw.dtype)
    itemsize = io_dtype.itemsize

    # Free reshapes only — NCHW kept, no transposes, no extra HBM traffic.
    x3 = x_nchw.reshape(B, C, S).astype(io_dtype)
    wT = jnp.transpose(w).astype(jnp.float32)               # (Cout, C), tiny
    b_col = jnp.reshape(b, (Cout, 1)).astype(jnp.float32)   # broadcasts over lanes

    has_dummy = dummy_nchw is not None
    n_in_blocks = 2 if has_dummy else 1
    # Double-buffered per-lane bytes: 2 * (input blocks + output block).
    bytes_per_lane = 2 * (n_in_blocks * C + Cout) * itemsize
    s_tile = _pick_s_tile(S, B, bytes_per_lane, vmem_budget_bytes)

    n_s = pl.cdiv(S, s_tile)            # ragged last block allowed
    grid = (n_s, B)                     # spatial first -> megacore-friendly at B==1

    x_spec = pl.BlockSpec((pl.Squeezed(), C, s_tile), lambda si, bi: (bi, 0, si))
    in_specs = [x_spec]
    operands = [x3]
    if has_dummy:
        in_specs.append(pl.BlockSpec((pl.Squeezed(), C, s_tile),
                                     lambda si, bi: (bi, 0, si)))
        operands.append(dummy_nchw.reshape(B, C, S).astype(io_dtype))
    in_specs += [
        pl.BlockSpec((Cout, C), lambda si, bi: (0, 0)),      # W^T, full, resident
        pl.BlockSpec((Cout, 1), lambda si, bi: (0, 0)),      # bias column
    ]
    operands += [wT, b_col]

    kernel = _rf_kernel_with_dummy if has_dummy else _rf_kernel

    bytes_accessed = (n_in_blocks * B * C * S * itemsize     # x (+ dummy)
                      + B * Cout * S * itemsize              # output
                      + (Cout * C + Cout) * 4)               # weight + bias
    cost = pl.CostEstimate(flops=2 * B * S * C * Cout,
                           transcendentals=0,
                           bytes_accessed=int(bytes_accessed))

    out3 = pl.pallas_call(
        kernel,
        out_shape=jax.ShapeDtypeStruct((B, Cout, S), io_dtype),
        grid_spec=pltpu.PrefetchScalarGridSpec(
            num_scalar_prefetch=0,
            grid=grid,
            in_specs=in_specs,
            out_specs=pl.BlockSpec((pl.Squeezed(), Cout, s_tile),
                                   lambda si, bi: (bi, 0, si)),
        ),
        compiler_params=pltpu.CompilerParams(
            dimension_semantics=("parallel", "parallel"),
            # <= v7x's 64 MiB physical VMEM, raises v5e's 16 MiB scoped default;
            # the budgeted working set (<= ~8 MiB) fits everywhere.
            vmem_limit_bytes=32 * 1024 * 1024,
        ),
        cost_estimate=cost,
    )(*operands)

    return out3.reshape(B, Cout, H, W)


# ---------------------------------------------------------------------------
# Self-test
# ---------------------------------------------------------------------------
if __name__ == "__main__":
    key = jax.random.PRNGKey(0)
    kx, kw, kb, kd = jax.random.split(key, 4)

    B, C, H, W = 2, 4, 16, 16
    Cout = 8

    x = jax.random.normal(kx, (B, C, H, W), dtype=jnp.float32)
    # Synthetic inner-model parameters (1x1 conv C->Cout + ReLU).
    w = jax.random.normal(kw, (C, Cout), dtype=jnp.float32) * 0.1
    b = jax.random.normal(kb, (1, Cout), dtype=jnp.float32) * 0.1

    def ref_fwd(x_in, dummy_in):
        xd = x_in * dummy_in
        x2d = jnp.transpose(xd, (0, 2, 3, 1)).reshape(-1, C)
        r = jnp.maximum(x2d @ w + b.reshape(1, Cout), 0.0)
        return jnp.transpose(r.reshape(B, H, W, Cout), (0, 3, 1, 2))

    # 1) Fast path: dummy is statically all-ones (RFModel init state) -> elided.
    out = jax.block_until_ready(rf_model_forward(x, w, b))
    assert out.shape == (B, Cout, H, W)
    assert jnp.allclose(out, ref_fwd(x, jnp.ones_like(x)), atol=1e-5, rtol=1e-5)

    # 2) Trained-dummy path: explicit non-ones dummy tensor, multiplied in-kernel.
    dummy = 1.0 + 0.05 * jax.random.normal(kd, (B, C, H, W), dtype=jnp.float32)
    out_d = jax.block_until_ready(rf_model_forward(x, w, b, dummy))
    assert jnp.allclose(out_d, ref_fwd(x, dummy), atol=1e-5, rtol=1e-5)

    # 3) bf16 I/O path: halves HBM bytes, f32 accumulate inside the kernel.
    out_bf = jax.block_until_ready(rf_model_forward(x, w, b, io_dtype=jnp.bfloat16))
    ref_bf = ref_fwd(x.astype(jnp.bfloat16).astype(jnp.float32), jnp.ones_like(x))
    assert jnp.allclose(out_bf.astype(jnp.float32), ref_bf, atol=3e-2, rtol=3e-2)

    print("KERNEL_OK")
</pallas_src>

<mosaic_0001>
module attributes {stable_mosaic.version = 11 : i64} {
  func.func @_rf_kernel(%arg0: i32, %arg1: i32, %arg2: memref<1x4x256xf32, #tpu.memory_space<vmem>>, %arg3: memref<8x4xf32, #tpu.memory_space<vmem>>, %arg4: memref<8x1xf32, #tpu.memory_space<vmem>>, %arg5: memref<1x8x256xf32, #tpu.memory_space<vmem>>) attributes {dimension_semantics = [#tpu.dimension_semantics<parallel>, #tpu.dimension_semantics<parallel>], iteration_bounds = array<i64: 1, 2>, scalar_prefetch = 0 : i64, scratch_operands = 0 : i64, tpu.core_type = #tpu.core_type<tc>, window_params = [{transform_indices = @transform_0, window_bounds = array<i64: 1, 4, 256>}, {pipeline_mode = #tpu.pipeline_mode<synchronous>, transform_indices = @transform_1, window_bounds = array<i64: 8, 4>}, {pipeline_mode = #tpu.pipeline_mode<synchronous>, transform_indices = @transform_2, window_bounds = array<i64: 8, 1>}, {transform_indices = @transform_3, window_bounds = array<i64: 1, 8, 256>}]} {
    %c0 = arith.constant 0 : index
    %c0_0 = arith.constant 0 : index
    %c0_1 = arith.constant 0 : index
    %0 = vector.load %arg2[%c0, %c0_0, %c0_1] : memref<1x4x256xf32, #tpu.memory_space<vmem>>, vector<1x4x256xf32>
    %1 = vector.shape_cast %0 : vector<1x4x256xf32> to vector<4x256xf32>
    %c0_2 = arith.constant 0 : index
    %c0_3 = arith.constant 0 : index
    %2 = vector.load %arg3[%c0_2, %c0_3] : memref<8x4xf32, #tpu.memory_space<vmem>>, vector<8x4xf32>
    %cst = arith.constant dense<0.000000e+00> : vector<8x256xf32>
    %3 = tpu.matmul %2, %1, %cst {dimension_numbers = #tpu.dot_dimension_numbers<[1], [0], [0], [1], [0, 0, 1, 1], [], []>} : vector<8x4xf32>, vector<4x256xf32>, vector<8x256xf32> -> vector<8x256xf32>
    %c0_4 = arith.constant 0 : index
    %c0_5 = arith.constant 0 : index
    %4 = vector.load %arg4[%c0_4, %c0_5] : memref<8x1xf32, #tpu.memory_space<vmem>>, vector<8x1xf32>
    %5 = vector.broadcast %4 : vector<8x1xf32> to vector<8x256xf32>
    %6 = arith.addf %3, %5 : vector<8x256xf32>
    %cst_6 = arith.constant 0.000000e+00 : f32
    %7 = vector.broadcast %cst_6 : f32 to vector<8x256xf32>
    %8 = arith.maximumf %6, %7 : vector<8x256xf32>
    %c0_7 = arith.constant 0 : index
    %c0_8 = arith.constant 0 : index
    %c0_9 = arith.constant 0 : index
    %9 = vector.load %arg5[%c0_7, %c0_8, %c0_9] : memref<1x8x256xf32, #tpu.memory_space<vmem>>, vector<1x8x256xf32>
    %10 = vector.shape_cast %9 : vector<1x8x256xf32> to vector<8x256xf32>
    %11 = vector.shape_cast %8 : vector<8x256xf32> to vector<1x8x256xf32>
    tpu.vector_store %arg5[%c0_7, %c0_8, %c0_9], %11 {strides = array<i32>} : memref<1x8x256xf32, #tpu.memory_space<vmem>>, vector<1x8x256xf32>,
    return
  }
  func.func @transform_0(%arg0: i32, %arg1: i32) -> (i32, i32, i32) {
    %c0_i32 = arith.constant 0 : i32
    %c0_i32_0 = arith.constant 0 : i32
    return %arg1, %c0_i32, %arg0 : i32, i32, i32
  }
  func.func @transform_1(%arg0: i32, %arg1: i32) -> (i32, i32) {
    %c0_i32 = arith.constant 0 : i32
    %c0_i32_0 = arith.constant 0 : i32
    %c0_i32_1 = arith.constant 0 : i32
    return %c0_i32, %c0_i32_0 : i32, i32
  }
  func.func @transform_2(%arg0: i32, %arg1: i32) -> (i32, i32) {
    %c0_i32 = arith.constant 0 : i32
    %c0_i32_0 = arith.constant 0 : i32
    %c0_i32_1 = arith.constant 0 : i32
    return %c0_i32, %c0_i32_0 : i32, i32
  }
  func.func @transform_3(%arg0: i32, %arg1: i32) -> (i32, i32, i32) {
    %c0_i32 = arith.constant 0 : i32
    %c0_i32_0 = arith.constant 0 : i32
    return %arg1, %c0_i32, %arg0 : i32, i32, i32
  }
}

</mosaic_0001>

<bundles_post_ra>
// kernel: tpu_custom_call.1
= control target key start
LH: loop header
LB: loop body
LE: loop exit
PB: predicated region body
PF: predicated region fallthrough
CT: control target
= control target key end

     0   :  { %8 = vsyncpa [#allocation3], 0  ;;  %s685_s0 = inlined_call_operand.vmem [shape: f32[2,4,256], index: 0, kind: input, shape index: {}]   ;;  %s686_s1 = inlined_call_operand.vmem [shape: f32[8,4], index: 1, kind: input, shape index: {}]   ;;  %s687_s2 = inlined_call_operand.vmem [shape: f32[8,1], index: 2, kind: input, shape index: {}]   ;;  %s688_s3 = inlined_call_operand.hbm [shape: f32[2,8,256], index: 3, kind: output, shape index: {}]  }
   0x1   :  { %10 = vsyncpa [#allocation3 + $0x1], 0  ;;  %s567_s12 = smov 0   ;;  %s569_s13 = smov 0  }
   0x2   :  { %s571_s14 = smov 0   ;;  %s573_s15 = smov 0  }
   0x3   :  { %s575_s16 = smov 0   ;;  %s577_s17 = smov 0  }
   0x4 LB: > { %s387_s18 = sadd.s32 4294967295, %s542_s17   ;;  %s388_s19 = sadd.s32 4294967294, %s542_s17   ;;  %s542_s17 = sphi %s577_s17, %s16_s17   ;;  %s538_s16 = sphi %s575_s16, %s695_s16   ;;  %s534_s15 = sphi %s573_s15, %s694_s15   ;;  %s530_s14 = sphi %s571_s14, %s693_s14   ;;  %s526_s13 = sphi %s569_s13, %s692_s13   ;;  %s522_s12 = sphi %s567_s12, %s691_s12  }
   0x5   : > { %s25_s20 = sadd.s32 1, %s538_s16  ;;  %s107_s21 = sadd.s32 1, %s530_s14 }
   0x6   : > { %p26_p0 = scmp.ge.s32.totalorder %s25_s20, 2  ;;  %p117_p1 = scmp.ne.s32.totalorder %s530_s14, %s526_s13 }
   0x7   : > { %p118_p2 = scmp.eq.s32.totalorder %s387_s18, 1  ;;  %p123_p3 = scmp.ne.s32.totalorder %s526_s13, %s522_s12 }
   0x8   : > { %s697_s20 = smov (%p26_p0, %s25_s20), 0  ;;  %p124_p5 = scmp.eq.s32.totalorder %s388_s19, 1 }
   0x9   : > { %p607_p4 = por %p118_p2, %p117_p1  ;;  %s102_s23 = ssub.s32 %s538_s16, %s697_s20 }
   0xa   : > { %p391_p6 = scmp.ge.s32.totalorder %s542_s17, 1  ;;  %p105_p7 = scmp.eq.s32.totalorder %s102_s23, 0 }
   0xb   : > { %p614_p8 = por %p124_p5, %p123_p3  ;;  %p161_p9 = scmp.lt.s32.totalorder %s542_s17, 3 }
   0xc   : > { %s620_s25 = scalar_select %p105_p7, %s530_s14, %s107_s21  }
   0xd   : > { %p162_p10 = pnand %p391_p6, %p161_p9 }
   0xe   : > { %p190_p11 = scmp.lt.s32.totalorder (!%p162_p10), %s534_s15, 1  ;;  %v544_v0 = vmov (!%p162_p10), 0.0   ;;  %v545_v1 = vmov (!%p162_p10), 0   ;;  %v202_v2 = vld [vmem:[%s687_s2] sm:$0xff] (!%p162_p10)  ;;  %vm214_vm0 = vcmask (!%p162_p10), 1043456   ;;  %vm210_vm1 = vcmask (!%p162_p10), 31744  }
   0xf   : > { %165 = sbr.rel (%p162_p10) target bundleno = 262 (0x106), region = 32  ;;  %283 = vmatprep.mubr.f32.mxu0 (!%p162_p10), %v544_v0  ;;  %462 = vset.pattern.permute.xlu0 (!%p162_p10), %v545_v1  ;;  %v201_v5 = vld [vmem:[%s686_s1] sm:$0xff] (!%p162_p10)  ;;  %s186_s8 = sand.u32 (!%p162_p10), 1, %s526_s13  }
  0x10   : > { %205 = vperm.xlu0 (!%p162_p10), %462, %v202_v2   ;;  %s392_s9 = sshll.u32 (!%p162_p10), %s186_s8, 4  ;;  %s404_s10 = sshll.u32 (!%p162_p10), %s534_s15, 8 }
  0x11   : > { %s188_s11 = scalar_lea.vmem (!%p162_p10), [#allocation2], %s392_s9  ;;  %s638_s23 = scalar_lea.hbm (!%p162_p10), %s688_s3, %s404_s10 }
  0x12   : > { %s311_s18 = sshll.u32 (!%p162_p10), %s188_s11, 4  ;;  %s295_s26 = scalar_lea.sflag (!%p162_p10), [#allocation3], %s186_s8  ;;  %s640_s18 = int_to_ptr.vmem [resolvable:$true] %s311_s18 }
  0x13   : > { %s464_s27 = scalar_lea.vmem (!%p162_p10), %s640_s18, 256 }
  0x14   : > { %p465_p12 = scmp.ne.s32.totalorder (!%p162_p10), %s640_s18, %s464_s27 }
  0x16   : > { %s191_s28 = scalar_select %p190_p11, %s534_s15, 1 }
  0x17   : > { %p466_p13 = pnand %p465_p12, %p607_p4  ;;  %s546_s15 = smov [#allocation2]  }
  0x18   : > { %s403_s29 = sshll.u32 %s191_s28, 3  ;;  %s468_s28 = sshll.u32 %s546_s15, 4  ;;  %s469_s28 = int_to_ptr.vmem [resolvable:$false] %s468_s28 }
  0x19   : > { %s197_s5 = scalar_lea.vmem %s685_s0, %s403_s29  ;;  %p467_p0 = pneg %p466_p13 }
  0x1a   : > { %v200_v3 = vld [vmem:[%s197_s5] sm:$0xff]  ;;  %s470_s29 = scalar_lea.vmem %s469_s28, 512  ;;  %p471_p1 = scmp.lt.s32.totalorder %s640_s18, %s469_s28 }
  0x1b   : > { %v209_v4 = vcombine.high %v200_v3, %v200_v3  ;;  %p472_p2 = scmp.lt.s32.totalorder %s470_s29, %s464_s27 }
  0x1d   : > { %395 = vmatprep.subr.msk.mxu0 %vm214_vm0, %v209_v4  ;;  %p473_p3 = por %p472_p2, %p471_p1 }
  0x1e   : > { %396 = vmatpush1.msk.msra.mxu0 %vm214_vm0, %v200_v3 }
  0x1f   : > { %397 = vmatmul.mubr.msk.f32.vlgmr.msra.gmra.mrb[0].mxu0 %vm210_vm1, %v201_v5  ;;  %p474_p5 = pnand %p473_p3, %p467_p0 }
  0x8f   : > { %v206_v6 = vpop.permute.xlu0 %205 }
  0xf2   : > { %v285_v7 = vpop.f32.mrb[0].mxu0 }
  0xf3   : > { %v286_v8 = vadd.f32 %v285_v7, %v206_v6  ;;  %v287_v9 = vpop.f32.mrb[1].mxu0 }
  0xf4   : > { %v288_v10 = vadd.f32 %v287_v9, %v206_v6 }
  0xf5   : > { %v290_v11 = vmax.f32 %v286_v8, 0.0 }
  0xf6   : > { %v291_v12 = vmax.f32 %v288_v10, 0.0 }
  0xf7   : > { %292 = vst [vmem:[%s188_s11] sm:$0xff] %v290_v11 }
  0xf8   : > { %293 = vst [vmem:[%s188_s11 + $0x8] sm:$0xff] %v291_v12 }
  0xf9   : > { %477 = shalt.err (!%p474_p5)
}
  0xfa   : > { %s478_s30 = scalar_lea.hbm %s638_s23, 256  ;;  %s482_s6 = scalar_lea.hbm %s688_s3, 512 }
  0xfb   : > { %p479_p6 = scmp.ne.s32.totalorder %s638_s23, %s478_s30  ;;  %p483_p10 = scmp.lt.u32.totalorder %s638_s23, %s688_s3 }
  0xfc   : > { %p484_p11 = scmp.lt.u32.totalorder %s482_s6, %s478_s30  ;;  %p486_p13 = scmp.lt.u32.totalorder %s478_s30, %s638_s23 }
  0xfd   : > { %p480_p7 = pnand %p479_p6, %p607_p4 }
  0xfe   : > { %p485_p12 = por %p484_p11, %p483_p10 }
  0xff   : > { %p481_p9 = pneg %p480_p7 }
 0x100   : > { %p487_p0 = por %p486_p13, %p485_p12 }
 0x102   : > { %p488_p1 = pnand %p487_p0, %p481_p9 }
 0x104   : > { %491 = shalt.err (!%p488_p1)
}
 0x105   : > { %405 = dma.vmem_to_hbm [thread:$0]  (%p607_p4), %s640_s18, 256, %s638_s23, %s295_s26  }
 0x106 PF: > { %p411_p2 = scmp.ge.s32.totalorder %s542_s17, 2  ;;  %s323_s9 = sand.u32 1, %s522_s12  }
 0x107   : > { %s324_s10 = scalar_lea.sflag [#allocation3], %s323_s9 }
 0x108   : > { %p408_p3 = pnand %p411_p2, %p614_p8 }
 0x10a   : > { %517 = dma.done.wait (!%p408_p3), %s324_s10, 256  }
 0x10b   : > { %519 = vsyncadd (!%p408_p3), %s324_s10, 4294967040  ;;  %s16_s17 = sadd.s32 1, %s542_s17   ;;  %s691_s12 = smov %s526_s13 }
 0x10c   : > { %p13_p5 = scmp.ge.s32.totalorder %s16_s17, 4   ;;  %s692_s13 = smov %s530_s14 }
 0x10d   : > { %s693_s14 = smov %s620_s25  ;;  %s694_s15 = smov %s538_s16 }
 0x10e   : > { %s695_s16 = smov %s697_s20  ;;  %15 = sbr.rel (!%p13_p5) target bundleno = 4 (0x4), region = 67 }
 0x115   :  { %329 = vsyncpa [#allocation3], 1 }
 0x116   :  { %331 = vsyncpa [#allocation3 + $0x1], 1 }

</bundles_post_ra>
